<compile_context>
chip_gen: v5e
topology: v5e:2x2
jax: 0.10.0
libtpu: 0.0.40
codegen_flags: <defaults>
</compile_context>

<pallas_src>
import functools

import jax
import jax.numpy as jnp
from jax.experimental import pallas as pl
from jax.experimental.pallas import tpu as pltpu


def _smoothing_loss_kernel(pred_ref, tgt_ref, out_ref, *,
                           confidence, off_value, num_classes,
                           batch_size, tile_rows):
    """pred_ref: (TB, C) VMEM, tgt_ref: (TB, 1) i32 VMEM, out_ref: (1, 1) f32 SMEM."""
    i = pl.program_id(0)

    # Zero the resident scalar accumulator on the first grid step.
    @pl.when(i == 0)
    def _init():
        out_ref[0, 0] = jnp.float32(0.0)

    x = pred_ref[...].astype(jnp.float32)                       # (TB, C), widen in-register
    tgt = tgt_ref[...]                                          # (TB, 1) int32

    # Mask rows of a ragged last tile (global row id >= B).  Zeroing the logits
    # keeps the softmax numerics finite; the per-row loss is masked again below.
    row = jax.lax.broadcasted_iota(jnp.int32, (tile_rows, 1), 0) + i * tile_rows
    valid = row < batch_size                                    # (TB, 1) bool
    x = jnp.where(valid, x, 0.0)

    # Numerically stable log-softmax pieces (no full logp tensor materialized).
    m = jnp.max(x, axis=-1, keepdims=True)                      # (TB, 1)
    z = x - m                                                   # (TB, C)
    lse = jnp.log(jnp.sum(jnp.exp(z), axis=-1, keepdims=True))  # (TB, 1)

    # z at the target class via iota compare (scatter_ equivalent), and row sum.
    col = jax.lax.broadcasted_iota(jnp.int32, z.shape, 1)       # (TB, C)
    z_tgt = jnp.sum(jnp.where(col == tgt, z, 0.0),
                    axis=-1, keepdims=True)                     # (TB, 1)
    sum_z = jnp.sum(z, axis=-1, keepdims=True)                  # (TB, 1)

    # loss_row = -sum_c smoothed_c * logp_c
    #          = -(off * (sum_z - C*lse) + (conf - off) * (z_tgt - lse))
    per_row = (-off_value) * (sum_z - num_classes * lse) \
              - (confidence - off_value) * (z_tgt - lse)        # (TB, 1)
    per_row = jnp.where(valid, per_row, 0.0)

    out_ref[0, 0] += jnp.sum(per_row)

    # Divide by the true batch size only once, on the last grid step.
    @pl.when(i == pl.num_programs(0) - 1)
    def _finalize():
        out_ref[0, 0] = out_ref[0, 0] / jnp.float32(batch_size)


def _pick_tile_rows(batch, num_classes, pred_itemsize, vmem_budget_bytes,
                    max_tile_rows=None):
    # Per-row VMEM: double-buffered pred tile + double-buffered target column
    # + ~3 live f32 (TB, C) temporaries inside the kernel body.
    bytes_per_row = num_classes * (2 * pred_itemsize + 3 * 4) + 2 * 4
    tb = int(vmem_budget_bytes // max(bytes_per_row, 1))
    tb = min(tb, 2048)                      # per-step overhead already amortized
    if max_tile_rows is not None:
        tb = min(tb, int(max_tile_rows))
    if tb >= batch:
        return batch                        # full-dim block: always legal
    tb = max(8, (tb // 8) * 8)              # (8, 128) sublane constraint
    return min(tb, batch)


def softmax_smoothing_loss(predictions, target, smoothing=0.2, max_tile_rows=None):
    """predictions: (B, C) float (any dtype), target: (B,) int labels. Scalar f32 loss."""
    B, C = predictions.shape
    confidence = 1.0 - smoothing
    off_value = smoothing / (C - 1)
    tgt_2d = target.astype(jnp.int32).reshape(B, 1)

    # Derive the VMEM budget per chip (v5e/v6e: 128 MiB, v7x: 64 MiB).
    try:
        vmem_cap = int(pltpu.get_tpu_info().vmem_capacity_bytes)
    except Exception:
        vmem_cap = 64 * 1024 * 1024         # conservative (v7x-sized) fallback
    vmem_budget = int(vmem_cap * 0.6)       # headroom for compiler scratch
    vmem_limit = int(vmem_cap * 0.75)

    tb = _pick_tile_rows(B, C, predictions.dtype.itemsize, vmem_budget,
                         max_tile_rows=max_tile_rows)
    grid = ((B + tb - 1) // tb,)

    kernel = functools.partial(
        _smoothing_loss_kernel,
        confidence=confidence,
        off_value=off_value,
        num_classes=C,
        batch_size=B,
        tile_rows=tb,
    )

    out = pl.pallas_call(
        kernel,
        out_shape=jax.ShapeDtypeStruct((1, 1), jnp.float32),
        grid=grid,
        in_specs=[
            pl.BlockSpec((tb, C), lambda i: (i, 0)),   # predictions, native dtype
            pl.BlockSpec((tb, 1), lambda i: (i, 0)),   # targets as (B, 1) int32
        ],
        out_specs=pl.BlockSpec(memory_space=pltpu.SMEM),  # resident scalar accumulator
        compiler_params=pltpu.CompilerParams(
            dimension_semantics=("arbitrary",),        # batch axis is a reduction
            vmem_limit_bytes=vmem_limit,
        ),
        cost_estimate=pl.CostEstimate(
            flops=8 * B * C,
            transcendentals=B * C + B,
            bytes_accessed=B * C * predictions.dtype.itemsize + B * 4 + 4,
        ),
    )(predictions, tgt_2d)
    return out[0, 0]


def _reference_loss(predictions, target, smoothing=0.2):
    B, C = predictions.shape
    confidence = 1.0 - smoothing
    logp = jax.nn.log_softmax(predictions.astype(jnp.float32), axis=-1)
    smoothed = jnp.full((B, C), smoothing / (C - 1), jnp.float32)
    smoothed = smoothed.at[jnp.arange(B), target].set(confidence)
    return jnp.mean(jnp.sum(-smoothed * logp, axis=-1))


if __name__ == "__main__":
    key = jax.random.PRNGKey(0)

    # 1) Base case: CIFAR-10-style head output (B=8, C=10), f32, single tile.
    k1, k2, k3, k4, k5, k6 = jax.random.split(key, 6)
    B, C = 8, 10
    preds = jax.random.normal(k1, (B, C), dtype=jnp.float32)
    tgt = jax.random.randint(k2, (B,), 0, C, dtype=jnp.int32)
    loss = jax.block_until_ready(softmax_smoothing_loss(preds, tgt, smoothing=0.2))
    ref = _reference_loss(preds, tgt, smoothing=0.2)
    assert jnp.allclose(loss, ref, atol=1e-5, rtol=1e-5), (loss, ref)

    # 2) Multi-step grid with a ragged last tile (B=20, forced 8-row tiles):
    #    exercises the cross-step accumulator, init/finalize guards and masking.
    B2, C2 = 20, 10
    preds2 = jax.random.normal(k3, (B2, C2), dtype=jnp.float32)
    tgt2 = jax.random.randint(k4, (B2,), 0, C2, dtype=jnp.int32)
    loss2 = jax.block_until_ready(
        softmax_smoothing_loss(preds2, tgt2, smoothing=0.2, max_tile_rows=8))
    ref2 = _reference_loss(preds2, tgt2, smoothing=0.2)
    assert jnp.allclose(loss2, ref2, atol=1e-5, rtol=1e-5), (loss2, ref2)

    # 3) bf16 ingestion path (no wrapper up-cast; widened in-kernel).
    B3, C3 = 16, 10
    preds3 = jax.random.normal(k5, (B3, C3), dtype=jnp.float32).astype(jnp.bfloat16)
    tgt3 = jax.random.randint(k6, (B3,), 0, C3, dtype=jnp.int32)
    loss3 = jax.block_until_ready(
        softmax_smoothing_loss(preds3, tgt3, smoothing=0.2, max_tile_rows=8))
    ref3 = _reference_loss(preds3, tgt3, smoothing=0.2)
    assert jnp.allclose(loss3, ref3, atol=2e-2, rtol=2e-2), (loss3, ref3)

    print("KERNEL_OK")
</pallas_src>

<mosaic_0001>
module attributes {stable_mosaic.version = 11 : i64} {
  func.func @_smoothing_loss_kernel(%arg0: i32, %arg1: memref<8x10xf32, #tpu.memory_space<vmem>>, %arg2: memref<8x1xi32, #tpu.memory_space<vmem>>, %arg3: memref<1x1xf32, #tpu.memory_space<smem>>) attributes {dimension_semantics = [#tpu.dimension_semantics<arbitrary>], iteration_bounds = array<i64: 1>, scalar_prefetch = 0 : i64, scratch_operands = 0 : i64, tpu.core_type = #tpu.core_type<tc>, window_params = [{transform_indices = @transform_0, window_bounds = array<i64: 8, 10>}, {transform_indices = @transform_1, window_bounds = array<i64: 8, 1>}, {transform_indices = @transform_2, window_bounds = array<i64: 1, 1>}]} {
    %c0_i32 = arith.constant 0 : i32
    %0 = arith.cmpi eq, %arg0, %c0_i32 : i32
    %1 = arith.extui %0 : i1 to i32
    %c0_i32_0 = arith.constant 0 : i32
    %2 = arith.cmpi ne, %1, %c0_i32_0 : i32
    scf.if %2 {
      %cst_21 = arith.constant 0.000000e+00 : f32
      %c0_22 = arith.constant 0 : index
      %c0_23 = arith.constant 0 : index
      %53 = memref.load %arg3[%c0_22, %c0_23] : memref<1x1xf32, #tpu.memory_space<smem>>
      memref.store %cst_21, %arg3[%c0_22, %c0_23] : memref<1x1xf32, #tpu.memory_space<smem>>
    } else {
    }
    %c0 = arith.constant 0 : index
    %c0_1 = arith.constant 0 : index
    %3 = vector.load %arg1[%c0, %c0_1] : memref<8x10xf32, #tpu.memory_space<vmem>>, vector<8x10xf32>
    %c0_2 = arith.constant 0 : index
    %c0_3 = arith.constant 0 : index
    %4 = vector.load %arg2[%c0_2, %c0_3] : memref<8x1xi32, #tpu.memory_space<vmem>>, vector<8x1xi32>
    %5 = tpu.iota {dimensions = array<i32: 0>} : vector<8x1xi32>
    %c8_i32 = arith.constant 8 : i32
    %6 = arith.muli %arg0, %c8_i32 : i32
    %7 = vector.broadcast %6 : i32 to vector<8x1xi32>
    %8 = arith.addi %5, %7 : vector<8x1xi32>
    %c8_i32_4 = arith.constant 8 : i32
    %9 = vector.broadcast %c8_i32_4 : i32 to vector<8x1xi32>
    %10 = arith.cmpi slt, %8, %9 : vector<8x1xi32>
    %cst = arith.constant 0.000000e+00 : f32
    %11 = vector.shape_cast %10 : vector<8x1xi1> to vector<8x1xi1>
    %12 = vector.broadcast %11 : vector<8x1xi1> to vector<8x10xi1>
    %13 = vector.broadcast %cst : f32 to vector<8x10xf32>
    %14 = arith.select %12, %3, %13 : vector<8x10xi1>, vector<8x10xf32>
    %cst_5 = arith.constant dense<0xFF800000> : vector<8xf32>
    %15 = vector.multi_reduction <maximumf>, %14, %cst_5 [1] : vector<8x10xf32> to vector<8xf32>
    %16 = vector.shape_cast %15 : vector<8xf32> to vector<8x1xf32>
    %17 = vector.broadcast %16 : vector<8x1xf32> to vector<8x10xf32>
    %18 = arith.subf %14, %17 : vector<8x10xf32>
    %19 = math.exp %18 : vector<8x10xf32>
    %cst_6 = arith.constant dense<0.000000e+00> : vector<8xf32>
    %20 = vector.multi_reduction <add>, %19, %cst_6 [1] : vector<8x10xf32> to vector<8xf32>
    %21 = vector.shape_cast %20 : vector<8xf32> to vector<8x1xf32>
    %22 = math.log %21 : vector<8x1xf32>
    %23 = tpu.iota {dimensions = array<i32: 1>} : vector<8x10xi32>
    %24 = vector.broadcast %4 : vector<8x1xi32> to vector<8x10xi32>
    %25 = arith.cmpi eq, %23, %24 : vector<8x10xi32>
    %cst_7 = arith.constant 0.000000e+00 : f32
    %26 = vector.broadcast %cst_7 : f32 to vector<8x10xf32>
    %27 = arith.select %25, %18, %26 : vector<8x10xi1>, vector<8x10xf32>
    %cst_8 = arith.constant dense<0.000000e+00> : vector<8xf32>
    %28 = vector.multi_reduction <add>, %27, %cst_8 [1] : vector<8x10xf32> to vector<8xf32>
    %29 = vector.shape_cast %28 : vector<8xf32> to vector<8x1xf32>
    %cst_9 = arith.constant dense<0.000000e+00> : vector<8xf32>
    %30 = vector.multi_reduction <add>, %18, %cst_9 [1] : vector<8x10xf32> to vector<8xf32>
    %31 = vector.shape_cast %30 : vector<8xf32> to vector<8x1xf32>
    %cst_10 = arith.constant 1.000000e+01 : f32
    %32 = vector.broadcast %cst_10 : f32 to vector<8x1xf32>
    %33 = arith.mulf %32, %22 : vector<8x1xf32>
    %34 = arith.subf %31, %33 : vector<8x1xf32>
    %cst_11 = arith.constant -0.0222222228 : f32
    %35 = vector.broadcast %cst_11 : f32 to vector<8x1xf32>
    %36 = arith.mulf %35, %34 : vector<8x1xf32>
    %37 = arith.subf %29, %22 : vector<8x1xf32>
    %cst_12 = arith.constant 0.777777791 : f32
    %38 = vector.broadcast %cst_12 : f32 to vector<8x1xf32>
    %39 = arith.mulf %38, %37 : vector<8x1xf32>
    %40 = arith.subf %36, %39 : vector<8x1xf32>
    %cst_13 = arith.constant 0.000000e+00 : f32
    %41 = vector.broadcast %cst_13 : f32 to vector<8x1xf32>
    %42 = arith.select %10, %40, %41 : vector<8x1xi1>, vector<8x1xf32>
    %c0_14 = arith.constant 0 : index
    %c0_15 = arith.constant 0 : index
    %43 = memref.load %arg3[%c0_14, %c0_15] : memref<1x1xf32, #tpu.memory_space<smem>>
    %44 = vector.shape_cast %42 : vector<8x1xf32> to vector<1x8x1xf32>
    %cst_16 = arith.constant dense<0.000000e+00> : vector<1xf32>
    %45 = vector.multi_reduction <add>, %44, %cst_16 [1, 2] : vector<1x8x1xf32> to vector<1xf32>
    %46 = vector.shape_cast %45 : vector<1xf32> to vector<1x1x1xf32>
    %47 = vector.extract %46[0, 0, 0] : f32 from vector<1x1x1xf32>
    %48 = arith.addf %43, %47 : f32
    %c0_17 = arith.constant 0 : index
    %c0_18 = arith.constant 0 : index
    %49 = memref.load %arg3[%c0_17, %c0_18] : memref<1x1xf32, #tpu.memory_space<smem>>
    memref.store %48, %arg3[%c0_17, %c0_18] : memref<1x1xf32, #tpu.memory_space<smem>>
    %c0_i32_19 = arith.constant 0 : i32
    %50 = arith.cmpi eq, %arg0, %c0_i32_19 : i32
    %51 = arith.extui %50 : i1 to i32
    %c0_i32_20 = arith.constant 0 : i32
    %52 = arith.cmpi ne, %51, %c0_i32_20 : i32
    scf.if %52 {
      %c0_21 = arith.constant 0 : index
      %c0_22 = arith.constant 0 : index
      %53 = memref.load %arg3[%c0_21, %c0_22] : memref<1x1xf32, #tpu.memory_space<smem>>
      %cst_23 = arith.constant 8.000000e+00 : f32
      %54 = arith.divf %53, %cst_23 : f32
      %c0_24 = arith.constant 0 : index
      %c0_25 = arith.constant 0 : index
      %55 = memref.load %arg3[%c0_24, %c0_25] : memref<1x1xf32, #tpu.memory_space<smem>>
      memref.store %54, %arg3[%c0_24, %c0_25] : memref<1x1xf32, #tpu.memory_space<smem>>
    } else {
    }
    return
  }
  func.func @transform_0(%arg0: i32) -> (i32, i32) {
    %c0_i32 = arith.constant 0 : i32
    %c0_i32_0 = arith.constant 0 : i32
    return %arg0, %c0_i32 : i32, i32
  }
  func.func @transform_1(%arg0: i32) -> (i32, i32) {
    %c0_i32 = arith.constant 0 : i32
    %c0_i32_0 = arith.constant 0 : i32
    return %arg0, %c0_i32 : i32, i32
  }
  func.func @transform_2(%arg0: i32) -> (i32, i32) {
    %c0_i32 = arith.constant 0 : i32
    %c0_i32_0 = arith.constant 0 : i32
    %c0_i32_1 = arith.constant 0 : i32
    return %c0_i32, %c0_i32_0 : i32, i32
  }
}

</mosaic_0001>

<bundles_post_ra>
// kernel: tpu_custom_call.1
= control target key start
LH: loop header
LB: loop body
LE: loop exit
PB: predicated region body
PF: predicated region fallthrough
CT: control target
= control target key end

     0   :  { %vm29_vm0 = vcmask 80896   ;;  %s165_s0 = inlined_call_operand.vmem [shape: f32[8,10], index: 0, kind: input, shape index: {}]   ;;  %s166_s1 = inlined_call_operand.vmem [shape: s32[8,1], index: 1, kind: input, shape index: {}]   ;;  %s167_s2 = inlined_call_operand.hbm [shape: f32[1,1], index: 2, kind: output, shape index: {}]  }
   0x1   :  { %v18_v0 = vld [vmem:[%s165_s0] sm:$0xff] }
   0x2   :  { %7 = vsyncpa [#allocation3], 0  ;;  %v30_v1 = vsel %vm29_vm0, %v18_v0, -inf  ;;  %v134_v2 = vmov 0   ;;  %v19_v3 = vld [vmem:[%s166_s1] sm:$0xff]  ;;  %v41_v10 = vlaneseq  ;;  %vm62_vm2 = vcmask 7168  }
   0x3   :  { %113 = vset.pattern.permute.xlu0 %v134_v2  ;;  %v135_v27 = vmov 8.0   ;;  %s95_s13 = sshll.u32 %s167_s2, 4  ;;  %s136_s17 = smov [#allocation2]   ;;  %s96_s13 = int_to_ptr.hbm [resolvable:$true] %s95_s13 }
   0x4   :  { %31 = vmax.xlane.f32.xlu0 %v30_v1  ;;  %v42_v11 = vand.u32 127, %v41_v10 }
  0x18   :  { %44 = vperm.xlu0 %113, %v19_v3  }
  0x77   :  { %v32_v4 = vpop.xlane.xlu0 %31 }
  0x78   :  { %v33_v5 = vsub.f32 %v18_v0, %v32_v4 }
  0x7a   :  { %v34_v6 = vmul.f32 1.442695, %v33_v5  ;;  %v51_v7 = vsel %vm29_vm0, %v33_v5, 0.0 }
  0x7b   :  { %52 = vadd.xlane.f32.xlu2 %v51_v7 }
  0x7c   :  { %114 = vpow2.f32 %v34_v6 }
  0x82   :  { %v115_v8 = vpop.eup %114 }
  0x83   :  { %v36_v9 = vsel %vm29_vm0, %v115_v8, 0.0 }
  0x84   :  { %37 = vadd.xlane.f32.xlu1 %v36_v9 }
  0x8a   :  { %v45_v12 = vpop.permute.xlu0 %44 }
  0x8b   :  { %vm46_vm1 = vcmp.eq.s32.totalorder %v42_v11, %v45_v12 }
  0x8c   :  { %v47_v13 = vsel %vm46_vm1, %v33_v5, 0.0 }
  0x8d   :  { %v48_v14 = vsel %vm29_vm0, %v47_v13, 0.0 }
  0x8e   :  { %49 = vadd.xlane.f32.xlu1 %v48_v14 }
  0xee   :  { %v53_v20 = vpop.xlane.xlu2 %52 }
  0xf7   :  { %v38_v15 = vpop.xlane.xlu1 %37 }
  0xf8   :  { %116 = vlog2.f32 %v38_v15 }
  0xf9   :  { %118 = vrcp.f32 %v135_v27 }
  0xfe   :  { %v117_v16 = vpop.eup %116 }
  0xff   :  { %v40_v17 = vmul.f32 0.6931472, %v117_v16  ;;  %v119_v28 = vpop.eup %118 }
 0x100   :  { %v81_v29 = vmul.f32 8.0, %v119_v28  ;;  %vm85_vm3 = vweird.f32 %v119_v28 }
 0x101   :  { %v54_v18 = vmul.f32 10.0, %v40_v17  ;;  %v50_v19 = vpop.xlane.xlu1 %49 }
 0x102   :  { %v57_v21 = vsub.f32 %v50_v19, %v40_v17  ;;  %v82_v30 = vsub.f32 1.0, %v81_v29 }
 0x103   :  { %v55_v22 = vsub.f32 %v53_v20, %v54_v18 }
 0x104   :  { %v58_v23 = vmul.f32 0.7777778, %v57_v21  ;;  %v83_v34 = vmul.f32 %v119_v28, %v82_v30 }
 0x105   :  { %v56_v24 = vmul.f32 -0.022222223, %v55_v22 }
 0x106   :  { %v84_v37 = vadd.f32 %v119_v28, %v83_v34 }
 0x107   :  { %v59_v25 = vsub.f32 %v56_v24, %v58_v23 }
 0x108   :  { %v86_v40 = vsel %vm85_vm3, %v119_v28, %v84_v37 }
 0x109   :  { %v63_v26 = vsel %vm62_vm2, %v59_v25, 0.0 }
 0x10a   :  { %64 = vadd.xlane.f32.xlu2 %v63_v26 }
 0x17d   :  { %v65_v31 = vpop.xlane.xlu2 %64 }
 0x17e   :  { %v66_v32 = vrot.slane %v65_v31, 4 }
 0x180   :  { %v67_v33 = vadd.f32 %v66_v32, %v65_v31 }
 0x182   :  { %v68_v35 = vrot.slane %v67_v33, 2 }
 0x184   :  { %v69_v36 = vadd.f32 %v68_v35, %v67_v33 }
 0x186   :  { %v70_v38 = vrot.slane %v69_v36, 1 }
 0x188   :  { %v71_v39 = vadd.f32 %v70_v38, %v69_v36 }
 0x18a   :  { %105 = vpush %v71_v39 }
 0x18b   :  { %107 = vpush %v86_v40 }
 0x1bb   :  { %s106_s14 = spop %105 }
 0x1bc   :  { %s108_s15 = spop %107 }
 0x1bd   :  { %s88_s16 = smul.f32 %s108_s15, %s106_s14 }
 0x1bf   :  { %89 = sst [smem:[#allocation2]] %s88_s16 }
 0x1c0   :  { %98 = dma.smem_to_hbm %s136_s17, 16, %s96_s13, [#allocation3]  }
 0x1c1   :  { %132 = dma.done.wait [#allocation3], 16  }
 0x1c2   :  { %133 = vsyncadd [#allocation3], 4294967280 }
 0x1c3   :  { %103 = sfence }
 0x1c4   :  { %104 = vsyncpa [#allocation3], 1 }

</bundles_post_ra>
